<compile_context>
chip_gen: v6e
topology: v6e:2x2x1
jax: 0.10.0
libtpu: 0.0.40
codegen_flags: <defaults>
</compile_context>

<pallas_src>
import functools

import jax
import jax.numpy as jnp
from jax.experimental import pallas as pl
from jax.experimental.pallas import tpu as pltpu


def _round_up(x, m):
    return (x + m - 1) // m * m


def _infonce_kernel(text_ref, cn_ref, rowloss_ref, colsum_ref,
                    *, inv_temp, b_true, block_rows, ragged):
    """One text row-tile vs. the full (resident, bf16, pre-normalized) ctr block."""
    i = pl.program_id(0)
    tm = text_ref.shape[0]          # block_rows
    bcols = cn_ref.shape[0]         # Bp (== B in the aligned case)

    # ---- normalize this text tile in f32; fold 1/temperature into the scale. ----
    t = text_ref[...].astype(jnp.float32)                               # (TM, D)
    ss_t = jnp.sum(t * t, axis=-1, keepdims=True)                       # (TM, 1)
    tn = t * (jax.lax.rsqrt(jnp.maximum(ss_t, 1e-12)) * inv_temp)       # (TM, D)

    # ---- diagonal sim_ii from the SAME bf16-normalized cn rows used for S. ----
    start = pl.multiple_of(i * block_rows, block_rows)
    cn_rows = cn_ref[pl.ds(start, block_rows), :].astype(jnp.float32)   # (TM, D)
    sim_ii = jnp.sum(tn * cn_rows, axis=-1, keepdims=True)              # (TM, 1), 1/T folded

    # ---- S tile on the MXU: bf16 operands, f32 accumulation, contract last dims. ----
    s = jax.lax.dot_general(
        tn.astype(jnp.bfloat16), cn_ref[...],
        dimension_numbers=(((1,), (1,)), ((), ())),
        preferred_element_type=jnp.float32)                             # (TM, Bp)

    if ragged:
        # Only compiled in when B % block_rows != 0: kill padded rows/columns so
        # they contribute exactly 0 to both reductions.
        row_id = start + jax.lax.broadcasted_iota(jnp.int32, (tm, 1), 0)
        col_id = jax.lax.broadcasted_iota(jnp.int32, (1, bcols), 1)
        valid = jnp.logical_and(row_id < b_true, col_id < b_true)
        s = jnp.where(valid, s, -1e30)

    # ---- ONE exp pass, static shift 1/T (cos/T <= 1/T), shared by both LSEs. ----
    p = jnp.exp(s - inv_temp)                                           # (TM, Bp)

    # Row logsumexp (text -> all ctr), minus both diagonal terms.
    row_sum = jnp.sum(p, axis=-1, keepdims=True)                        # (TM, 1)
    row_lse = inv_temp + jnp.log(row_sum)
    rowloss_ref[...] = row_lse - 2.0 * sim_ii                           # (TM, 1)

    # Partial column sums (ctr -> all text); finalized in the JAX epilogue.
    colsum_ref[...] = jnp.sum(p, axis=0, keepdims=True)                 # (1, Bp)


def infonce_loss(text_emb, ctr_emb, *, temperature=1.0, block_rows=None):
    """Bidirectional InfoNCE loss with cosine scorer. Returns scalar f32 mean loss."""
    B, D = text_emb.shape
    assert ctr_emb.shape == (B, D)
    inv_temp = float(1.0 / temperature)
    # Static-shift exp requires exp(-2/T) to stay representable in f32.
    assert 2.0 * inv_temp <= 80.0, "temperature too small for the static-shift path"

    # Generation-aware VMEM capacity (v5e/v6e 128 MiB, v7x 64 MiB); safe fallback.
    try:
        vmem_cap = int(getattr(pltpu.get_tpu_info(), "vmem_capacity_bytes",
                               64 * 1024 * 1024))
    except Exception:
        vmem_cap = 64 * 1024 * 1024

    # Row-tile size: multiple of 8 sublanes; larger tiles amortize per-step overhead.
    if block_rows is None:
        if B <= 512:
            block_rows = _round_up(B, 8)
        elif vmem_cap >= 100 * 1024 * 1024 and B <= 4096:
            block_rows = 512            # plenty of VMEM (v5e/v6e): fewer grid steps
        else:
            block_rows = 256
    block_rows = max(8, _round_up(int(block_rows), 8))
    block_rows = min(block_rows, _round_up(B, 8))   # never tile wider than the batch

    Bp = _round_up(B, block_rows)
    ragged = (Bp != B)
    n_tiles = Bp // block_rows

    # Cosine-normalize ctr ONCE (it is whole-kernel, not per-tile, work) and cast to
    # bf16: this is the MXU RHS, keeps the raw f32 ctr out of VMEM entirely, and
    # removes the step-0 init that previously serialized the grid axis.
    c = ctr_emb.astype(jnp.float32)
    c = c * jax.lax.rsqrt(jnp.maximum(jnp.sum(c * c, axis=-1, keepdims=True), 1e-12))
    cn = c.astype(jnp.bfloat16)

    text_p = text_emb
    if ragged:  # pad batch rows only (feature dim is never padded)
        text_p = jnp.pad(text_emb, ((0, Bp - B), (0, 0)))
        cn = jnp.pad(cn, ((0, Bp - B), (0, 0)))

    kernel = functools.partial(
        _infonce_kernel,
        inv_temp=inv_temp, b_true=int(B),
        block_rows=int(block_rows), ragged=bool(ragged),
    )

    # VMEM budget estimate (double-buffered text tiles, resident bf16 cn, f32 temps).
    itemsize = jnp.dtype(text_p.dtype).itemsize
    est = (2 * block_rows * D * itemsize        # streamed text tiles
           + 2 * Bp * D * 2                     # resident bf16 normalized ctr
           + 3 * block_rows * Bp * 4            # S / p temporaries
           + 4 * block_rows * D * 4             # f32 text temporaries
           + 2 * (block_rows + Bp) * 4          # outputs
           + (2 << 20))                         # headroom
    vmem_limit = int(min(0.85 * vmem_cap, max(est * 1.25, 32 * 1024 * 1024)))

    row_loss, colsum = pl.pallas_call(
        kernel,
        out_shape=(jax.ShapeDtypeStruct((Bp, 1), jnp.float32),
                   jax.ShapeDtypeStruct((n_tiles, Bp), jnp.float32)),
        grid=(n_tiles,),
        in_specs=[
            pl.BlockSpec((block_rows, D), lambda i: (i, 0)),  # streamed text tiles
            pl.BlockSpec((Bp, D), lambda i: (0, 0)),          # resident bf16 ctr
        ],
        out_specs=(
            pl.BlockSpec((block_rows, 1), lambda i: (i, 0)),  # per-row loss pieces
            pl.BlockSpec((1, Bp), lambda i: (i, 0)),          # per-tile column sums
        ),
        compiler_params=pltpu.CompilerParams(
            dimension_semantics=("parallel",),                # no carried state
            vmem_limit_bytes=vmem_limit,
        ),
    )(text_p, cn)

    # Tiny O(B) epilogue: combine partial column sums and per-row pieces.
    colsum_total = jnp.sum(colsum, axis=0)[:B]                # (B,)
    col_lse = inv_temp + jnp.log(colsum_total)                # logsumexp_j S[j, i]
    loss = (jnp.sum(row_loss[:B, 0]) + jnp.sum(col_lse)) / B
    return loss


def _infonce_ref(text_emb, ctr_emb, temperature=1.0):
    """Pure-JAX f32 reference mirroring the PyTorch forward."""
    tn = text_emb / jnp.linalg.norm(text_emb, axis=-1, keepdims=True)
    cn = ctr_emb / jnp.linalg.norm(ctr_emb, axis=-1, keepdims=True)
    S = tn @ cn.T / temperature
    sim_ii = jnp.diag(S)
    loss1 = jax.scipy.special.logsumexp(S, axis=1) - sim_ii
    loss2 = jax.scipy.special.logsumexp(S.T, axis=1) - sim_ii
    return jnp.mean(loss1 + loss2)


if __name__ == "__main__":
    key = jax.random.PRNGKey(0)
    k1, k2 = jax.random.split(key)

    # Small demo shape consistent with the module (single-tile, aligned path).
    B, D = 8, 32
    text_emb = jax.random.normal(k1, (B, D), dtype=jnp.float32)
    ctr_emb = jax.random.normal(k2, (B, D), dtype=jnp.float32)

    loss = infonce_loss(text_emb, ctr_emb, temperature=1.0)
    jax.block_until_ready(loss)
    ref = _infonce_ref(text_emb, ctr_emb, 1.0)
    # bf16 MXU operands -> slightly looser tolerance than a pure-f32 matmul.
    assert jnp.allclose(loss, ref, atol=3e-2, rtol=3e-2), (loss, ref)

    # Multi-tile + ragged-batch + temperature path (B=13, block_rows=8 -> 2 tiles).
    k3, k4 = jax.random.split(jax.random.PRNGKey(1))
    B2, D2 = 13, 32
    t2 = jax.random.normal(k3, (B2, D2), dtype=jnp.float32)
    c2 = jax.random.normal(k4, (B2, D2), dtype=jnp.float32)
    loss2 = infonce_loss(t2, c2, temperature=0.5, block_rows=8)
    jax.block_until_ready(loss2)
    ref2 = _infonce_ref(t2, c2, 0.5)
    assert jnp.allclose(loss2, ref2, atol=3e-2, rtol=3e-2), (loss2, ref2)

    print("KERNEL_OK")
</pallas_src>

<mosaic_0001>
module attributes {stable_mosaic.version = 11 : i64} {
  func.func @_infonce_kernel(%arg0: i32, %arg1: memref<8x32xf32, #tpu.memory_space<vmem>>, %arg2: memref<8x32xbf16, #tpu.memory_space<vmem>>, %arg3: memref<8x1xf32, #tpu.memory_space<vmem>>, %arg4: memref<1x8xf32, #tpu.memory_space<vmem>>) attributes {dimension_semantics = [#tpu.dimension_semantics<parallel>], iteration_bounds = array<i64: 1>, scalar_prefetch = 0 : i64, scratch_operands = 0 : i64, tpu.core_type = #tpu.core_type<tc>, window_params = [{transform_indices = @transform_0, window_bounds = array<i64: 8, 32>}, {pipeline_mode = #tpu.pipeline_mode<synchronous>, transform_indices = @transform_1, window_bounds = array<i64: 8, 32>}, {transform_indices = @transform_2, window_bounds = array<i64: 8, 1>}, {transform_indices = @transform_3, window_bounds = array<i64: 1, 8>}]} {
    %c0 = arith.constant 0 : index
    %c0_0 = arith.constant 0 : index
    %0 = vector.load %arg1[%c0, %c0_0] : memref<8x32xf32, #tpu.memory_space<vmem>>, vector<8x32xf32>
    %1 = arith.mulf %0, %0 : vector<8x32xf32>
    %cst = arith.constant dense<0.000000e+00> : vector<8xf32>
    %2 = vector.multi_reduction <add>, %1, %cst [1] : vector<8x32xf32> to vector<8xf32>
    %3 = vector.shape_cast %2 : vector<8xf32> to vector<8x1xf32>
    %cst_1 = arith.constant 9.99999996E-13 : f32
    %4 = vector.broadcast %cst_1 : f32 to vector<8x1xf32>
    %5 = arith.maximumf %3, %4 : vector<8x1xf32>
    %6 = math.rsqrt %5 : vector<8x1xf32>
    %cst_2 = arith.constant 1.000000e+00 : f32
    %7 = vector.broadcast %cst_2 : f32 to vector<8x1xf32>
    %8 = arith.mulf %6, %7 : vector<8x1xf32>
    %9 = vector.broadcast %8 : vector<8x1xf32> to vector<8x32xf32>
    %10 = arith.mulf %0, %9 : vector<8x32xf32>
    %c8_i32 = arith.constant 8 : i32
    %11 = arith.muli %arg0, %c8_i32 : i32
    %12 = tpu.assume_multiple %11, 8 : i32
    %13 = arith.index_cast %12 : i32 to index
    %c0_3 = arith.constant 0 : index
    %14 = vector.load %arg2[%13, %c0_3] : memref<8x32xbf16, #tpu.memory_space<vmem>>, vector<8x32xbf16>
    %15 = arith.extf %14 : vector<8x32xbf16> to vector<8x32xf32>
    %16 = arith.mulf %10, %15 : vector<8x32xf32>
    %cst_4 = arith.constant dense<0.000000e+00> : vector<8xf32>
    %17 = vector.multi_reduction <add>, %16, %cst_4 [1] : vector<8x32xf32> to vector<8xf32>
    %18 = vector.shape_cast %17 : vector<8xf32> to vector<8x1xf32>
    %19 = arith.truncf %10 : vector<8x32xf32> to vector<8x32xbf16>
    %c0_5 = arith.constant 0 : index
    %c0_6 = arith.constant 0 : index
    %20 = vector.load %arg2[%c0_5, %c0_6] : memref<8x32xbf16, #tpu.memory_space<vmem>>, vector<8x32xbf16>
    %cst_7 = arith.constant dense<0.000000e+00> : vector<8x8xf32>
    %21 = tpu.matmul %19, %20, %cst_7 {dimension_numbers = #tpu.dot_dimension_numbers<[1], [1], [0], [0], [0, 0, 1, 0], [], []>} : vector<8x32xbf16>, vector<8x32xbf16>, vector<8x8xf32> -> vector<8x8xf32>
    %cst_8 = arith.constant 1.000000e+00 : f32
    %22 = vector.broadcast %cst_8 : f32 to vector<8x8xf32>
    %23 = arith.subf %21, %22 : vector<8x8xf32>
    %24 = math.exp %23 : vector<8x8xf32>
    %cst_9 = arith.constant dense<0.000000e+00> : vector<8xf32>
    %25 = vector.multi_reduction <add>, %24, %cst_9 [1] : vector<8x8xf32> to vector<8xf32>
    %26 = vector.shape_cast %25 : vector<8xf32> to vector<8x1xf32>
    %27 = math.log %26 : vector<8x1xf32>
    %cst_10 = arith.constant 1.000000e+00 : f32
    %28 = vector.broadcast %cst_10 : f32 to vector<8x1xf32>
    %29 = arith.addf %28, %27 : vector<8x1xf32>
    %cst_11 = arith.constant 2.000000e+00 : f32
    %30 = vector.broadcast %cst_11 : f32 to vector<8x1xf32>
    %31 = arith.mulf %30, %18 : vector<8x1xf32>
    %32 = arith.subf %29, %31 : vector<8x1xf32>
    %c0_12 = arith.constant 0 : index
    %c0_13 = arith.constant 0 : index
    %33 = vector.load %arg3[%c0_12, %c0_13] : memref<8x1xf32, #tpu.memory_space<vmem>>, vector<8x1xf32>
    tpu.vector_store %arg3[%c0_12, %c0_13], %32 {strides = array<i32>} : memref<8x1xf32, #tpu.memory_space<vmem>>, vector<8x1xf32>,
    %cst_14 = arith.constant dense<0.000000e+00> : vector<8xf32>
    %34 = vector.multi_reduction <add>, %24, %cst_14 [0] : vector<8x8xf32> to vector<8xf32>
    %35 = vector.shape_cast %34 : vector<8xf32> to vector<1x8xf32>
    %c0_15 = arith.constant 0 : index
    %c0_16 = arith.constant 0 : index
    %36 = vector.load %arg4[%c0_15, %c0_16] : memref<1x8xf32, #tpu.memory_space<vmem>>, vector<1x8xf32>
    tpu.vector_store %arg4[%c0_15, %c0_16], %35 {strides = array<i32>} : memref<1x8xf32, #tpu.memory_space<vmem>>, vector<1x8xf32>,
    return
  }
  func.func @transform_0(%arg0: i32) -> (i32, i32) {
    %c0_i32 = arith.constant 0 : i32
    %c0_i32_0 = arith.constant 0 : i32
    return %arg0, %c0_i32 : i32, i32
  }
  func.func @transform_1(%arg0: i32) -> (i32, i32) {
    %c0_i32 = arith.constant 0 : i32
    %c0_i32_0 = arith.constant 0 : i32
    %c0_i32_1 = arith.constant 0 : i32
    return %c0_i32, %c0_i32_0 : i32, i32
  }
  func.func @transform_2(%arg0: i32) -> (i32, i32) {
    %c0_i32 = arith.constant 0 : i32
    %c0_i32_0 = arith.constant 0 : i32
    return %arg0, %c0_i32 : i32, i32
  }
  func.func @transform_3(%arg0: i32) -> (i32, i32) {
    %c0_i32 = arith.constant 0 : i32
    %c0_i32_0 = arith.constant 0 : i32
    return %arg0, %c0_i32 : i32, i32
  }
}

</mosaic_0001>

<bundles_post_ra>
// kernel: tpu_custom_call.1
= control target key start
LH: loop header
LB: loop body
LE: loop exit
PB: predicated region body
PF: predicated region fallthrough
CT: control target
= control target key end

     0   :  { %9 = vsyncpa [#allocation3], 0  ;;  %s279_s0 = inlined_call_operand.hbm [shape: f32[8,32], index: 0, kind: input, shape index: {}]   ;;  %s280_s1 = inlined_call_operand.hbm [shape: bf16[8,32], index: 1, kind: input, shape index: {}]   ;;  %s281_s2 = inlined_call_operand.vmem [shape: f32[8,1], index: 2, kind: output, shape index: {0}]   ;;  %s282_s3 = inlined_call_operand.hbm [shape: f32[1,8], index: 3, kind: output, shape index: {1}]  }
   0x1   :  { %10 = vsyncpa [#allocation6], 0 }
   0x2   :  { %11 = vsyncpa [#allocation4], 0  ;;  %s238_s12 = smov [#allocation2]   ;;  %s239_s14 = smov [#allocation5]  }
   0x3   :  { %s18_s13 = sshll.u32 %s238_s12, 4  ;;  %s28_s15 = sshll.u32 %s239_s14, 4  ;;  %s19_s13 = int_to_ptr.vmem [resolvable:$true] %s18_s13  ;;  %s29_s15 = int_to_ptr.vmem [resolvable:$true] %s28_s15 }
   0x4   :  { %s180_s16 = scalar_lea.vmem %s19_s13, 128  ;;  %p185_p1 = scmp.lt.s32.totalorder %s19_s13, %s19_s13 }
   0x5   :  { %p181_p0 = scmp.ne.s32.totalorder %s19_s13, %s180_s16  ;;  %p186_p2 = scmp.lt.s32.totalorder %s180_s16, %s180_s16 }
   0x7   :  { %p187_p3 = por %p186_p2, %p185_p1 }
   0x9   :  { %p188_p4 = pnand %p187_p3, %p181_p0 }
   0xb   :  { %191 = shalt.err (!%p188_p4)
}
   0xc   :  { %21 = dma.hbm_to_vmem [thread:$0]  %s279_s0, 128, %s19_s13, [#allocation3]  }
   0xd   :  { %s200_s19 = scalar_lea.vmem %s29_s15, 64  ;;  %p205_p6 = scmp.lt.s32.totalorder %s29_s15, %s29_s15 }
   0xe   :  { %p201_p5 = scmp.ne.s32.totalorder %s29_s15, %s200_s19  ;;  %p206_p7 = scmp.lt.s32.totalorder %s200_s19, %s200_s19 }
  0x10   :  { %p207_p8 = por %p206_p7, %p205_p6 }
  0x12   :  { %p208_p9 = pnand %p207_p8, %p201_p5 }
  0x14   :  { %211 = shalt.err (!%p208_p9)
}
  0x15   :  { %31 = dma.hbm_to_vmem [thread:$0]  %s280_s1, 64, %s29_s15, [#allocation6]  }
  0x16   :  { %232 = dma.done.wait [#allocation3], 128  }
  0x17   :  { %233 = vsyncadd [#allocation3], 4294967168 }
  0x18   :  { %234 = dma.done.wait [#allocation6], 64  }
  0x19   :  { %235 = vsyncadd [#allocation6], 4294967232  ;;  %v39_v0 = vld [vmem:[#allocation2] sm:$0xff]  ;;  %vm41_vm0 = vcmask 261120   ;;  %v60_v3 = vld [vmem:[#allocation5] sm:$0xf] }
  0x1a   :  { %v40_v1 = vmul.f32 %v39_v0, %v39_v0  ;;  %v240_v4 = vmov 0.0   ;;  %v65_v5 = vsel %vm41_vm0, %v60_v3, 0  ;;  %vm241_vm1 = vmmov 0   ;;  %v53_v8 = vld [vmem:[#allocation5] sm:$0xf]  ;;  %s242_s0 = smov [#allocation7]  }
  0x1b   :  { %155 = vmatprep.subr.bf16.mxu0 %v240_v4  ;;  %157 = vmatprep.mubr.msk.bf16.mxu0 %vm241_vm1, %v240_v4  ;;  %v54_v9 = vunpack.c.l.bf16 %v53_v8  ;;  %vm110_vm2 = vcmask 64512   ;;  %vm127_vm3 = vcmask 57344   ;;  %s137_s1 = sshll.u32 %s242_s0, 4  ;;  %s138_s1 = int_to_ptr.vmem [resolvable:$true] %s137_s1 }
  0x1c   :  { %v42_v2 = vsel %vm41_vm0, %v40_v1, 0.0  ;;  %156 = vmatpush3.bf16.xpose.msra.mxu0 %v65_v5  ;;  %s212_s22 = scalar_lea.vmem %s138_s1, 16  ;;  %s216_s23 = scalar_lea.vmem %s138_s1, 32 }
  0x1d   :  { %43 = vadd.xlane.f32.xlu0 %v42_v2  ;;  %p213_p10 = scmp.ne.s32.totalorder %s138_s1, %s212_s22  ;;  %p217_p11 = scmp.lt.s32.totalorder %s138_s1, %s138_s1 }
  0x1e   :  { %p218_p12 = scmp.lt.s32.totalorder %s216_s23, %s212_s22 }
  0x20   :  { %p219_p13 = por %p218_p12, %p217_p11 }
  0x22   :  { %p220_p0 = pnand %p219_p13, %p213_p10 }
  0xa6   :  { %v44_v6 = vpop.xlane.xlu0 %43 }
  0xa7   :  { %v45_v7 = vmax.f32 %v44_v6, 1e-12 }
  0xa9   :  { %166 = vrsqrt.f32 %v45_v7 }
  0xb6   :  { %v167_v10 = vpop.eup %166 }
  0xb7   :  { %v47_v11 = vmul.f32 %v167_v10, %v39_v0 }
  0xb9   :  { %v59_v12 = vpack.c.bf16 %v47_v11, %v47_v11  ;;  %v55_v13 = vmul.f32 %v54_v9, %v47_v11 }
  0xbb   :  { %158 = vmatmul.mubr.msk.bf16.vlgmr.msra.gmra.mxu0 %vm41_vm0, %v59_v12  ;;  %v56_v14 = vsel %vm41_vm0, %v55_v13, 0.0 }
  0xbc   :  { %57 = vadd.xlane.f32.xlu1 %v56_v14 }
 0x17b   :  { %v101_v15 = vpop.f32.mrf.mxu0 }
 0x17c   :  { %v152_v16 = vadd.f32 -1.0, %v101_v15 }
 0x17d   :  { %v159_v17 = vpop.f32.mrf.mxu0 }
 0x17e   :  { %v108_v18 = vmul.f32 1.442695, %v152_v16 }
 0x17f   :  { %v104_v19 = vpop.f32.mrf.mxu0 }
 0x180   :  { %168 = vpow2.f32 %v108_v18 }
 0x181   :  { %v160_v20 = vpop.f32.mrf.mxu0 }
 0x18d   :  { %v169_v21 = vpop.eup %168 }
 0x18e   :  { %v111_v22 = vsel %vm110_vm2, %v169_v21, 0.0 }
 0x18f   :  { %112 = vadd.xlane.f32.xlu0 %v111_v22  ;;  %v121_v23 = vrot.slane %v111_v22, 4 }
 0x191   :  { %v122_v24 = vadd.f32 %v121_v23, %v111_v22 }
 0x193   :  { %v123_v25 = vrot.slane %v122_v24, 2 }
 0x195   :  { %v124_v26 = vadd.f32 %v123_v25, %v122_v24 }
 0x197   :  { %v125_v27 = vrot.slane %v124_v26, 1 }
 0x199   :  { %v126_v28 = vadd.f32 %v125_v27, %v124_v26 }
 0x19b   :  { %128 = vst.msk [vmem:[#allocation7] sm:$0x1] %vm127_vm3, %v126_v28 }
 0x19c   :  { %223 = shalt.err (!%p220_p0)
}
 0x19d   :  { %140 = dma.vmem_to_hbm [thread:$0]  %s138_s1, 16, %s282_s3, [#allocation4]   ;;  %v58_v31 = vpop.xlane.xlu1 %57  ;;  %vm119_vm4 = vcmask 7168  }
 0x19e   :  { %v117_v33 = vmul.f32 2.0, %v58_v31 }
 0x218   :  { %v113_v29 = vpop.xlane.xlu0 %112 }
 0x219   :  { %170 = vlog2.f32 %v113_v29 }
 0x226   :  { %v171_v30 = vpop.eup %170 }
 0x227   :  { %v115_v32 = vmul.f32 0.6931472, %v171_v30 }
 0x229   :  { %v116_v34 = vadd.f32 1.0, %v115_v32 }
 0x22b   :  { %v118_v35 = vsub.f32 %v116_v34, %v117_v33 }
 0x22d   :  { %120 = vst.msk [vmem:[%s281_s2] sm:$0xff] %vm119_vm4, %v118_v35 }
 0x22e   :  { %236 = dma.done.wait [#allocation4], 16  }
 0x22f   :  { %237 = vsyncadd [#allocation4], 4294967280 }
 0x230   :  { %146 = vsyncpa [#allocation3], 1 }
 0x231   :  { %147 = vsyncpa [#allocation6], 1 }
 0x232   :  { %148 = vsyncpa [#allocation4], 1 }

</bundles_post_ra>
